<compile_context>
chip_gen: v6e
topology: v6e:2x2x1
jax: 0.10.0
libtpu: 0.0.40
codegen_flags: <defaults>
</compile_context>

<pallas_src>
import functools

import jax
import jax.numpy as jnp
from jax.experimental import pallas as pl
from jax.experimental.pallas import tpu as pltpu


# ----------------------------------------------------------------------------
# Fused kernel: LayerNorm -> Linear1 + GELU -> Linear2 on one row tile.
# ----------------------------------------------------------------------------
def _mlp_kernel(x_ref, p_ref, w1_ref, w2_ref, o_ref, *, eps, dim, mlp_size, n_out):
    # Packed params (rows of p_ref, lane start always 0 -> no lane rotation):
    gamma = p_ref[0:1, 0:dim]        # (1, dim)      f32
    beta = p_ref[1:2, 0:dim]         # (1, dim)      f32
    b1 = p_ref[2:3, 0:mlp_size]      # (1, mlp_size) f32
    b2 = p_ref[3:4, 0:n_out]         # (1, n_out)    f32 (zero beyond dim)

    # ---- LayerNorm (f32) ----
    x = x_ref[...].astype(jnp.float32)                         # (tm, dim)
    mu = jnp.mean(x, axis=-1, keepdims=True)
    var = jnp.mean(jnp.square(x - mu), axis=-1, keepdims=True)
    xn = (x - mu) * jax.lax.rsqrt(var + eps)
    xn = xn * gamma + beta                                      # (tm, dim) f32

    # ---- Linear1 (bf16 operands, f32 accum) + tanh-approx GELU (EUP path) ----
    h = jnp.dot(xn.astype(jnp.bfloat16), w1_ref[...],
                preferred_element_type=jnp.float32)             # (tm, mlp_size)
    h = h + b1
    h = jax.nn.gelu(h, approximate=True)   # ~1e-3 deviation vs exact-erf GELU

    # ---- Linear2 (bf16 operands, f32 accum), lane-dense (n_out = 128k) output ----
    y = jnp.dot(h.astype(jnp.bfloat16), w2_ref[...],
                preferred_element_type=jnp.float32)             # (tm, n_out)
    y = y + b2

    # Dropout layers are identity in eval mode.
    o_ref[...] = y.astype(o_ref.dtype)


def _pick_row_tile(M, block_rows):
    """Return (tm, Mp). Prefer tiles that divide M so x never needs padding."""
    if M <= block_rows:
        return M, M                                   # single block, grid=(1,)
    start = min(block_rows, M)
    start -= start % 8
    for tm in range(start, 7, -8):                    # largest mult-of-8 divisor
        if M % tm == 0:
            return tm, M
    # Rare fallback: ragged M with no good divisor -> pad rows.
    tm = max(8, (block_rows // 8) * 8)
    return tm, pl.cdiv(M, tm) * tm


def pallas_mlp(x, gamma, beta, w1, b1, w2, b2, *, eps=1e-5, block_rows=512):
    """x: (..., dim); w1: (dim, mlp_size); w2: (mlp_size, dim)."""
    orig_shape = x.shape
    dim = orig_shape[-1]
    mlp_size = w1.shape[1]

    x2 = x.reshape(-1, dim)                  # keep original dtype; kernel upcasts
    M = x2.shape[0]

    # NOTE(v7x): with 2 TensorCores one would force an even #blocks here so the
    # "parallel" grid axis shards across both cores; on 1-TC chips (v5e/v6e) a
    # single large block minimizes per-step overhead.
    tm, Mp = _pick_row_tile(M, block_rows)
    xp = x2 if Mp == M else jnp.pad(x2, ((0, Mp - M), (0, 0)))

    # Lane-dense output width (multiple of 128) -> unmasked vst + wide writeback DMA.
    n_out = pl.cdiv(dim, 128) * 128

    # bf16 only for the MXU operands (weights); LN/bias params stay f32.
    w1b = w1.astype(jnp.bfloat16)                                   # (dim, mlp_size)
    w2b = jnp.zeros((mlp_size, n_out), jnp.bfloat16).at[:, :dim].set(
        w2.astype(jnp.bfloat16))                                    # (mlp_size, n_out)

    # Pack the four small param vectors into one (4, P) block (one input, one DMA).
    P = max(128, dim, mlp_size, n_out)
    params = jnp.zeros((4, P), jnp.float32)
    params = params.at[0, :dim].set(gamma.astype(jnp.float32))
    params = params.at[1, :dim].set(beta.astype(jnp.float32))
    params = params.at[2, :mlp_size].set(b1.astype(jnp.float32))
    params = params.at[3, :dim].set(b2.astype(jnp.float32))         # pad cols stay 0

    grid = (Mp // tm,)
    out = pl.pallas_call(
        functools.partial(_mlp_kernel, eps=eps, dim=dim, mlp_size=mlp_size,
                          n_out=n_out),
        out_shape=jax.ShapeDtypeStruct((Mp, n_out), x2.dtype),
        grid=grid,
        in_specs=[
            pl.BlockSpec((tm, dim), lambda i: (i, 0)),           # x tile
            pl.BlockSpec((4, P), lambda i: (0, 0)),              # packed params
            pl.BlockSpec((dim, mlp_size), lambda i: (0, 0)),     # w1 (full, resident)
            pl.BlockSpec((mlp_size, n_out), lambda i: (0, 0)),   # w2 padded (resident)
        ],
        out_specs=pl.BlockSpec((tm, n_out), lambda i: (i, 0)),
        compiler_params=pltpu.CompilerParams(
            dimension_semantics=("parallel",),
        ),
    )(xp, params, w1b, w2b)

    out = out[:M, :dim]
    return out.reshape(orig_shape)


if __name__ == "__main__":
    # Small shapes implied by the module: tokens (B, N, dim) with dim=32, mlp_size=64.
    B, N, dim, mlp_size = 2, 64, 32, 64

    key = jax.random.PRNGKey(0)
    ks = jax.random.split(key, 7)
    x = jax.random.normal(ks[0], (B, N, dim), jnp.float32)
    gamma = 1.0 + 0.1 * jax.random.normal(ks[1], (dim,), jnp.float32)
    beta = 0.1 * jax.random.normal(ks[2], (dim,), jnp.float32)
    w1 = 0.05 * jax.random.normal(ks[3], (dim, mlp_size), jnp.float32)
    b1 = 0.02 * jax.random.normal(ks[4], (mlp_size,), jnp.float32)
    w2 = 0.05 * jax.random.normal(ks[5], (mlp_size, dim), jnp.float32)
    b2 = 0.02 * jax.random.normal(ks[6], (dim,), jnp.float32)

    out = pallas_mlp(x, gamma, beta, w1, b1, w2, b2)
    out = jax.block_until_ready(out)

    # Pure-JAX f32 reference with exact-erf GELU (matches PyTorch nn.GELU default);
    # kernel uses the tanh approximation (~1e-3 drift, inside tolerance).
    # TODO(synk): training-mode dropout (p=0.1) intentionally not implemented (eval mode).
    def ref_mlp(xr):
        x2 = xr.reshape(-1, dim)
        mu = jnp.mean(x2, axis=-1, keepdims=True)
        var = jnp.mean(jnp.square(x2 - mu), axis=-1, keepdims=True)
        xn = (x2 - mu) * jax.lax.rsqrt(var + 1e-5) * gamma + beta
        h = xn @ w1 + b1
        h = 0.5 * h * (1.0 + jax.lax.erf(h * 0.7071067811865475))
        y = h @ w2 + b2
        return y.reshape(xr.shape)

    ref = ref_mlp(x)
    assert out.shape == (B, N, dim), out.shape
    assert jnp.all(jnp.isfinite(out))
    max_err = float(jnp.max(jnp.abs(out - ref)))
    assert jnp.allclose(out, ref, atol=1e-2, rtol=1e-2), max_err
    print("KERNEL_OK")
</pallas_src>

<mosaic_0001>
module attributes {stable_mosaic.version = 11 : i64} {
  func.func @_mlp_kernel(%arg0: i32, %arg1: memref<128x32xf32, #tpu.memory_space<vmem>>, %arg2: memref<4x128xf32, #tpu.memory_space<vmem>>, %arg3: memref<32x64xbf16, #tpu.memory_space<vmem>>, %arg4: memref<64x128xbf16, #tpu.memory_space<vmem>>, %arg5: memref<128x128xf32, #tpu.memory_space<vmem>>) attributes {dimension_semantics = [#tpu.dimension_semantics<parallel>], iteration_bounds = array<i64: 1>, scalar_prefetch = 0 : i64, scratch_operands = 0 : i64, tpu.core_type = #tpu.core_type<tc>, window_params = [{transform_indices = @transform_0, window_bounds = array<i64: 128, 32>}, {pipeline_mode = #tpu.pipeline_mode<synchronous>, transform_indices = @transform_1, window_bounds = array<i64: 4, 128>}, {pipeline_mode = #tpu.pipeline_mode<synchronous>, transform_indices = @transform_2, window_bounds = array<i64: 32, 64>}, {pipeline_mode = #tpu.pipeline_mode<synchronous>, transform_indices = @transform_3, window_bounds = array<i64: 64, 128>}, {transform_indices = @transform_4, window_bounds = array<i64: 128, 128>}]} {
    %c0 = arith.constant 0 : index
    %c0_0 = arith.constant 0 : index
    %0 = vector.load %arg2[%c0, %c0_0] : memref<4x128xf32, #tpu.memory_space<vmem>>, vector<1x32xf32>
    %c1 = arith.constant 1 : index
    %c0_1 = arith.constant 0 : index
    %1 = vector.load %arg2[%c1, %c0_1] : memref<4x128xf32, #tpu.memory_space<vmem>>, vector<1x32xf32>
    %c2 = arith.constant 2 : index
    %c0_2 = arith.constant 0 : index
    %2 = vector.load %arg2[%c2, %c0_2] : memref<4x128xf32, #tpu.memory_space<vmem>>, vector<1x64xf32>
    %c3 = arith.constant 3 : index
    %c0_3 = arith.constant 0 : index
    %3 = vector.load %arg2[%c3, %c0_3] : memref<4x128xf32, #tpu.memory_space<vmem>>, vector<1x128xf32>
    %c0_4 = arith.constant 0 : index
    %c0_5 = arith.constant 0 : index
    %4 = vector.load %arg1[%c0_4, %c0_5] : memref<128x32xf32, #tpu.memory_space<vmem>>, vector<128x32xf32>
    %cst = arith.constant dense<0.000000e+00> : vector<128xf32>
    %5 = vector.multi_reduction <add>, %4, %cst [1] : vector<128x32xf32> to vector<128xf32>
    %6 = vector.shape_cast %5 : vector<128xf32> to vector<128x1xf32>
    %cst_6 = arith.constant 3.200000e+01 : f32
    %7 = vector.broadcast %cst_6 : f32 to vector<128x1xf32>
    %8 = arith.divf %6, %7 : vector<128x1xf32>
    %9 = vector.broadcast %8 : vector<128x1xf32> to vector<128x32xf32>
    %10 = arith.subf %4, %9 : vector<128x32xf32>
    %11 = arith.mulf %10, %10 : vector<128x32xf32>
    %cst_7 = arith.constant dense<0.000000e+00> : vector<128xf32>
    %12 = vector.multi_reduction <add>, %11, %cst_7 [1] : vector<128x32xf32> to vector<128xf32>
    %13 = vector.shape_cast %12 : vector<128xf32> to vector<128x1xf32>
    %cst_8 = arith.constant 3.200000e+01 : f32
    %14 = vector.broadcast %cst_8 : f32 to vector<128x1xf32>
    %15 = arith.divf %13, %14 : vector<128x1xf32>
    %16 = vector.broadcast %8 : vector<128x1xf32> to vector<128x32xf32>
    %17 = arith.subf %4, %16 : vector<128x32xf32>
    %cst_9 = arith.constant 9.99999974E-6 : f32
    %18 = vector.broadcast %cst_9 : f32 to vector<128x1xf32>
    %19 = arith.addf %15, %18 : vector<128x1xf32>
    %20 = math.rsqrt %19 : vector<128x1xf32>
    %21 = vector.broadcast %20 : vector<128x1xf32> to vector<128x32xf32>
    %22 = arith.mulf %17, %21 : vector<128x32xf32>
    %23 = vector.broadcast %0 : vector<1x32xf32> to vector<128x32xf32>
    %24 = arith.mulf %22, %23 : vector<128x32xf32>
    %25 = vector.broadcast %1 : vector<1x32xf32> to vector<128x32xf32>
    %26 = arith.addf %24, %25 : vector<128x32xf32>
    %27 = arith.truncf %26 : vector<128x32xf32> to vector<128x32xbf16>
    %c0_10 = arith.constant 0 : index
    %c0_11 = arith.constant 0 : index
    %28 = vector.load %arg3[%c0_10, %c0_11] : memref<32x64xbf16, #tpu.memory_space<vmem>>, vector<32x64xbf16>
    %cst_12 = arith.constant dense<0.000000e+00> : vector<128x64xf32>
    %29 = tpu.matmul %27, %28, %cst_12 {dimension_numbers = #tpu.dot_dimension_numbers<[1], [0], [0], [1], [0, 0, 1, 1], [], []>} : vector<128x32xbf16>, vector<32x64xbf16>, vector<128x64xf32> -> vector<128x64xf32>
    %30 = vector.broadcast %2 : vector<1x64xf32> to vector<128x64xf32>
    %31 = arith.addf %29, %30 : vector<128x64xf32>
    %32 = arith.mulf %31, %31 : vector<128x64xf32>
    %33 = arith.mulf %31, %32 : vector<128x64xf32>
    %cst_13 = arith.constant 4.471500e-02 : f32
    %34 = vector.broadcast %cst_13 : f32 to vector<128x64xf32>
    %35 = arith.mulf %34, %33 : vector<128x64xf32>
    %36 = arith.addf %31, %35 : vector<128x64xf32>
    %cst_14 = arith.constant 0.797884583 : f32
    %37 = vector.broadcast %cst_14 : f32 to vector<128x64xf32>
    %38 = arith.mulf %37, %36 : vector<128x64xf32>
    %39 = math.tanh %38 : vector<128x64xf32>
    %cst_15 = arith.constant 1.000000e+00 : f32
    %40 = vector.broadcast %cst_15 : f32 to vector<128x64xf32>
    %41 = arith.addf %40, %39 : vector<128x64xf32>
    %cst_16 = arith.constant 5.000000e-01 : f32
    %42 = vector.broadcast %cst_16 : f32 to vector<128x64xf32>
    %43 = arith.mulf %42, %41 : vector<128x64xf32>
    %44 = arith.mulf %31, %43 : vector<128x64xf32>
    %45 = arith.truncf %44 : vector<128x64xf32> to vector<128x64xbf16>
    %c0_17 = arith.constant 0 : index
    %c0_18 = arith.constant 0 : index
    %46 = vector.load %arg4[%c0_17, %c0_18] : memref<64x128xbf16, #tpu.memory_space<vmem>>, vector<64x128xbf16>
    %cst_19 = arith.constant dense<0.000000e+00> : vector<128x128xf32>
    %47 = tpu.matmul %45, %46, %cst_19 {dimension_numbers = #tpu.dot_dimension_numbers<[1], [0], [0], [1], [0, 0, 1, 1], [], []>} : vector<128x64xbf16>, vector<64x128xbf16>, vector<128x128xf32> -> vector<128x128xf32>
    %48 = vector.broadcast %3 : vector<1x128xf32> to vector<128x128xf32>
    %49 = arith.addf %47, %48 : vector<128x128xf32>
    %c0_20 = arith.constant 0 : index
    %c0_21 = arith.constant 0 : index
    %50 = vector.load %arg5[%c0_20, %c0_21] : memref<128x128xf32, #tpu.memory_space<vmem>>, vector<128x128xf32>
    tpu.vector_store %arg5[%c0_20, %c0_21], %49 {strides = array<i32>} : memref<128x128xf32, #tpu.memory_space<vmem>>, vector<128x128xf32>,
    return
  }
  func.func @transform_0(%arg0: i32) -> (i32, i32) {
    %c0_i32 = arith.constant 0 : i32
    %c0_i32_0 = arith.constant 0 : i32
    return %arg0, %c0_i32 : i32, i32
  }
  func.func @transform_1(%arg0: i32) -> (i32, i32) {
    %c0_i32 = arith.constant 0 : i32
    %c0_i32_0 = arith.constant 0 : i32
    %c0_i32_1 = arith.constant 0 : i32
    return %c0_i32, %c0_i32_0 : i32, i32
  }
  func.func @transform_2(%arg0: i32) -> (i32, i32) {
    %c0_i32 = arith.constant 0 : i32
    %c0_i32_0 = arith.constant 0 : i32
    %c0_i32_1 = arith.constant 0 : i32
    return %c0_i32, %c0_i32_0 : i32, i32
  }
  func.func @transform_3(%arg0: i32) -> (i32, i32) {
    %c0_i32 = arith.constant 0 : i32
    %c0_i32_0 = arith.constant 0 : i32
    %c0_i32_1 = arith.constant 0 : i32
    return %c0_i32, %c0_i32_0 : i32, i32
  }
  func.func @transform_4(%arg0: i32) -> (i32, i32) {
    %c0_i32 = arith.constant 0 : i32
    %c0_i32_0 = arith.constant 0 : i32
    return %arg0, %c0_i32 : i32, i32
  }
}

</mosaic_0001>

<bundles_post_ra>
// kernel: tpu_custom_call.1
= control target key start
LH: loop header
LB: loop body
LE: loop exit
PB: predicated region body
PF: predicated region fallthrough
CT: control target
= control target key end

     0   :  { %vm39_vm0 = vcmask 261120   ;;  %s1414_s0 = inlined_call_operand.vmem [shape: f32[128,32], index: 0, kind: input, shape index: {}]   ;;  %s1415_s1 = inlined_call_operand.vmem [shape: f32[4,128], index: 1, kind: input, shape index: {}]   ;;  %s1416_s2 = inlined_call_operand.vmem [shape: bf16[32,64], index: 2, kind: input, shape index: {}]   ;;  %s1417_s3 = inlined_call_operand.vmem [shape: bf16[64,128], index: 3, kind: input, shape index: {}]   ;;  %s1418_s4 = inlined_call_operand.hbm [shape: f32[128,128], index: 4, kind: output, shape index: {}]  }
   0x1   :  { %v23_v0 = vld [vmem:[%s1414_s0] sm:$0xff]  ;;  %v25_v1 = vld [vmem:[%s1414_s0 + $0x10] sm:$0xff]  ;;  %v24_v2 = vld [vmem:[%s1414_s0 + $0x8] sm:$0xff] }
   0x2   :  { %v40_v3 = vsel %vm39_vm0, %v23_v0, 0.0  ;;  %v46_v4 = vsel %vm39_vm0, %v25_v1, 0.0  ;;  %v26_v5 = vld [vmem:[%s1414_s0 + $0x18] sm:$0xff]  ;;  %v1012_v6 = vld [vmem:[%s1414_s0 + $0x20] sm:$0xff]  ;;  %v43_v7 = vsel %vm39_vm0, %v24_v2, 0.0  ;;  %v28_v9 = vld [vmem:[%s1414_s0 + $0x28] sm:$0xff] }
   0x3   :  { %41 = vadd.xlane.f32.xlu0 %v40_v3  ;;  %47 = vadd.xlane.f32.xlu1 %v46_v4  ;;  %v49_v8 = vsel %vm39_vm0, %v26_v5, 0.0  ;;  %v52_v10 = vsel %vm39_vm0, %v1012_v6, 0.0  ;;  %v55_v11 = vsel %vm39_vm0, %v28_v9, 0.0  ;;  %v1025_v12 = vld [vmem:[%s1414_s0 + $0x30] sm:$0xff]  ;;  %v1030_v13 = vld [vmem:[%s1414_s0 + $0x38] sm:$0xff] }
   0x7   :  { %44 = vadd.xlane.f32.xlu0 %v43_v7  ;;  %50 = vadd.xlane.f32.xlu1 %v49_v8 }
   0xb   :  { %53 = vadd.xlane.f32.xlu0 %v52_v10  ;;  %56 = vadd.xlane.f32.xlu1 %v55_v11 }
   0xc   :  { %9 = vsyncpa [#allocation3], 0  ;;  %v58_v14 = vsel %vm39_vm0, %v1025_v12, 0.0  ;;  %v61_v15 = vsel %vm39_vm0, %v1030_v13, 0.0  ;;  %v1039_v16 = vld [vmem:[%s1414_s0 + $0x40] sm:$0xff]  ;;  %v1044_v17 = vld [vmem:[%s1414_s0 + $0x48] sm:$0xff] }
   0xd   :  { %v64_v18 = vsel %vm39_vm0, %v1039_v16, 0.0  ;;  %v67_v19 = vsel %vm39_vm0, %v1044_v17, 0.0  ;;  %v1053_v20 = vld [vmem:[%s1414_s0 + $0x50] sm:$0xff]  ;;  %v1058_v21 = vld [vmem:[%s1414_s0 + $0x58] sm:$0xff]  ;;  %v1067_v24 = vld [vmem:[%s1414_s0 + $0x60] sm:$0xff]  ;;  %vm626_vm1 = vcmask 523264  }
   0xe   :  { %v70_v22 = vsel %vm39_vm0, %v1053_v20, 0.0  ;;  %v73_v23 = vsel %vm39_vm0, %v1058_v21, 0.0  ;;  %v1072_v25 = vld [vmem:[%s1414_s0 + $0x68] sm:$0xff]  ;;  %v76_v26 = vsel %vm39_vm0, %v1067_v24, 0.0  ;;  %v1081_v28 = vld [vmem:[%s1414_s0 + $0x70] sm:$0xff]  ;;  %v1086_v29 = vld [vmem:[%s1414_s0 + $0x78] sm:$0xff] }
   0xf   :  { %59 = vadd.xlane.f32.xlu0 %v58_v14  ;;  %62 = vadd.xlane.f32.xlu1 %v61_v15  ;;  %v79_v27 = vsel %vm39_vm0, %v1072_v25, 0.0  ;;  %v82_v30 = vsel %vm39_vm0, %v1081_v28, 0.0  ;;  %v85_v31 = vsel %vm39_vm0, %v1086_v29, 0.0 }
  0x13   :  { %65 = vadd.xlane.f32.xlu0 %v64_v18  ;;  %68 = vadd.xlane.f32.xlu1 %v67_v19 }
  0x17   :  { %71 = vadd.xlane.f32.xlu0 %v70_v22  ;;  %74 = vadd.xlane.f32.xlu1 %v73_v23 }
  0x1b   :  { %77 = vadd.xlane.f32.xlu0 %v76_v26  ;;  %80 = vadd.xlane.f32.xlu1 %v79_v27 }
  0x1f   :  { %83 = vadd.xlane.f32.xlu0 %v82_v30  ;;  %86 = vadd.xlane.f32.xlu1 %v85_v31 }
  0x8c   :  { %v42_v32 = vpop.xlane.xlu0 %41  ;;  %v48_v33 = vpop.xlane.xlu1 %47 }
  0x8d   :  { %v89_v34 = vmul.f32 0.03125, %v42_v32  ;;  %v91_v35 = vmul.f32 0.03125, %v48_v33 }
  0x8f   :  { %v1092_v36 = vsub.f32 %v23_v0, %v89_v34  ;;  %v1094_v37 = vsub.f32 %v25_v1, %v91_v35 }
  0x90   :  { %v45_v38 = vpop.xlane.xlu0 %44  ;;  %v51_v39 = vpop.xlane.xlu1 %50 }
  0x91   :  { %v90_v40 = vmul.f32 0.03125, %v45_v38  ;;  %v92_v41 = vmul.f32 0.03125, %v51_v39  ;;  %v121_v42 = vmul.f32 %v1092_v36, %v1092_v36  ;;  %v123_v43 = vmul.f32 %v1094_v37, %v1094_v37 }
  0x93   :  { %v1100_v44 = vsub.f32 %v24_v2, %v90_v40  ;;  %v1102_v45 = vsub.f32 %v26_v5, %v92_v41  ;;  %v137_v46 = vsel %vm39_vm0, %v121_v42, 0.0  ;;  %v143_v49 = vsel %vm39_vm0, %v123_v43, 0.0 }
  0x94   :  { %138 = vadd.xlane.f32.xlu0 %v137_v46  ;;  %v54_v47 = vpop.xlane.xlu0 %53  ;;  %v57_v48 = vpop.xlane.xlu1 %56 }
  0x95   :  { %v93_v50 = vmul.f32 0.03125, %v54_v47  ;;  %v94_v51 = vmul.f32 0.03125, %v57_v48  ;;  %v122_v52 = vmul.f32 %v1100_v44, %v1100_v44  ;;  %v124_v53 = vmul.f32 %v1102_v45, %v1102_v45 }
  0x97   :  { %v1111_v54 = vsub.f32 %v1012_v6, %v93_v50  ;;  %v1113_v55 = vsub.f32 %v28_v9, %v94_v51  ;;  %v140_v56 = vsel %vm39_vm0, %v122_v52, 0.0  ;;  %v146_v59 = vsel %vm39_vm0, %v124_v53, 0.0  ;;  %v876_v53 = vld [vmem:[%s1416_s2] sm:$0xff]  }
  0x98   :  { %144 = vadd.xlane.f32.xlu0 %v143_v49  ;;  %141 = vadd.xlane.f32.xlu1 %v140_v56  ;;  %v60_v57 = vpop.xlane.xlu0 %59  ;;  %v63_v58 = vpop.xlane.xlu1 %62 }
  0x99   :  { %v95_v60 = vmul.f32 0.03125, %v60_v57  ;;  %v96_v61 = vmul.f32 0.03125, %v63_v58  ;;  %v125_v62 = vmul.f32 %v1111_v54, %v1111_v54  ;;  %v126_v63 = vmul.f32 %v1113_v55, %v1113_v55 }
  0x9b   :  { %v1122_v0 = vsub.f32 %v1025_v12, %v95_v60  ;;  %v1125_v1 = vsub.f32 %v1030_v13, %v96_v61  ;;  %v149_v2 = vsel %vm39_vm0, %v125_v62, 0.0  ;;  %v152_v5 = vsel %vm39_vm0, %v126_v63, 0.0 }
  0x9c   :  { %147 = vadd.xlane.f32.xlu1 %v146_v59  ;;  %150 = vadd.xlane.f32.xlu0 %v149_v2  ;;  %v66_v3 = vpop.xlane.xlu0 %65  ;;  %v69_v4 = vpop.xlane.xlu1 %68 }
  0x9d   :  { %v97_v6 = vmul.f32 0.03125, %v66_v3  ;;  %v98_v7 = vmul.f32 0.03125, %v69_v4  ;;  %v127_v8 = vmul.f32 %v1122_v0, %v1122_v0  ;;  %v128_v9 = vmul.f32 %v1125_v1, %v1125_v1 }
  0x9f   :  { %v1134_v10 = vsub.f32 %v1039_v16, %v97_v6  ;;  %v1137_v11 = vsub.f32 %v1044_v17, %v98_v7  ;;  %v155_v12 = vsel %vm39_vm0, %v127_v8, 0.0  ;;  %v158_v15 = vsel %vm39_vm0, %v128_v9, 0.0 }
  0xa0   :  { %153 = vadd.xlane.f32.xlu1 %v152_v5  ;;  %156 = vadd.xlane.f32.xlu0 %v155_v12  ;;  %v72_v13 = vpop.xlane.xlu0 %71  ;;  %v75_v14 = vpop.xlane.xlu1 %74 }
  0xa1   :  { %v99_v18 = vmul.f32 0.03125, %v72_v13  ;;  %v100_v19 = vmul.f32 0.03125, %v75_v14  ;;  %v129_v22 = vmul.f32 %v1134_v10, %v1134_v10  ;;  %v130_v16 = vmul.f32 %v1137_v11, %v1137_v11 }
  0xa3   :  { %v1146_v23 = vsub.f32 %v1053_v20, %v99_v18  ;;  %v1149_v17 = vsub.f32 %v1058_v21, %v100_v19  ;;  %v161_v26 = vsel %vm39_vm0, %v129_v22, 0.0  ;;  %v164_v31 = vsel %vm39_vm0, %v130_v16, 0.0 }
  0xa4   :  { %159 = vadd.xlane.f32.xlu1 %v158_v15  ;;  %162 = vadd.xlane.f32.xlu0 %v161_v26  ;;  %v78_v27 = vpop.xlane.xlu0 %77  ;;  %v81_v30 = vpop.xlane.xlu1 %80 }
  0xa5   :  { %v101_v32 = vmul.f32 0.03125, %v78_v27  ;;  %v102_v33 = vmul.f32 0.03125, %v81_v30  ;;  %v131_v34 = vmul.f32 %v1146_v23, %v1146_v23  ;;  %v132_v20 = vmul.f32 %v1149_v17, %v1149_v17 }
  0xa7   :  { %v1158_v35 = vsub.f32 %v1067_v24, %v101_v32  ;;  %v1161_v21 = vsub.f32 %v1072_v25, %v102_v33  ;;  %v167_v38 = vsel %vm39_vm0, %v131_v34, 0.0  ;;  %v170_v41 = vsel %vm39_vm0, %v132_v20, 0.0  ;;  %v1192_v32 = vld [vmem:[%s1415_s1] ss:$0 sm:$0xff] }
  0xa8   :  { %165 = vadd.xlane.f32.xlu1 %v164_v31  ;;  %168 = vadd.xlane.f32.xlu0 %v167_v38  ;;  %v84_v39 = vpop.xlane.xlu0 %83  ;;  %v87_v40 = vpop.xlane.xlu1 %86 }
  0xa9   :  { %v103_v42 = vmul.f32 0.03125, %v84_v39  ;;  %v104_v43 = vmul.f32 0.03125, %v87_v40  ;;  %v133_v46 = vmul.f32 %v1158_v35, %v1158_v35  ;;  %v134_v24 = vmul.f32 %v1161_v21, %v1161_v21 }
  0xab   :  { %v1170_v47 = vsub.f32 %v1081_v28, %v103_v42  ;;  %v1173_v25 = vsub.f32 %v1086_v29, %v104_v43  ;;  %v173_v48 = vsel %vm39_vm0, %v133_v46, 0.0  ;;  %v176_v49 = vsel %vm39_vm0, %v134_v24, 0.0  ;;  %v875_v29 = vld [vmem:[%s1416_s2 + $0x8] sm:$0xff]   ;;  %v1199_v24 = vld [vmem:[%s1415_s1 + $0x1] ss:$0 sm:$0xff] }
  0xac   :  { %171 = vadd.xlane.f32.xlu1 %v170_v41  ;;  %174 = vadd.xlane.f32.xlu0 %v173_v48 }
  0xad   :  { %v135_v50 = vmul.f32 %v1170_v47, %v1170_v47  ;;  %v136_v51 = vmul.f32 %v1173_v25, %v1173_v25  ;;  %828 = vmatprep.subr.bf16.mxu0 %v875_v29 }
  0xae   :  { %829 = vmatpush3.bf16.msra.mxu0 %v875_v29 }
  0xaf   :  { %v179_v52 = vsel %vm39_vm0, %v135_v50, 0.0  ;;  %v182_v28 = vsel %vm39_vm0, %v136_v51, 0.0  ;;  %830 = vmatprep.subr.bf16.mxu0 %v876_v53 }
  0xb0   :  { %177 = vadd.xlane.f32.xlu1 %v176_v49  ;;  %180 = vadd.xlane.f32.xlu0 %v179_v52 }
  0xb2   :  { %831 = vmatpush3.bf16.msra.mxu0 %v876_v53 }
  0xb4   :  { %183 = vadd.xlane.f32.xlu1 %v182_v28 }
 0x11d   :  { %v139_v56 = vpop.xlane.xlu0 %138 }
 0x11e   :  { %v185_v57 = vmul.f32 0.03125, %v139_v56 }
 0x120   :  { %v201_v58 = vadd.f32 1e-05, %v185_v57 }
 0x121   :  { %v142_v59 = vpop.xlane.xlu1 %141  ;;  %v145_v60 = vpop.xlane.xlu0 %144 }
 0x122   :  { %881 = vrsqrt.f32 %v201_v58  ;;  %v186_v61 = vmul.f32 0.03125, %v142_v59  ;;  %v187_v62 = vmul.f32 0.03125, %v145_v60 }
 0x124   :  { %v202_v63 = vadd.f32 1e-05, %v186_v61  ;;  %v203_v2 = vadd.f32 1e-05, %v187_v62 }
 0x125   :  { %v148_v3 = vpop.xlane.xlu1 %147  ;;  %v151_v4 = vpop.xlane.xlu0 %150 }
 0x126   :  { %883 = vrsqrt.f32 %v202_v63  ;;  %v188_v5 = vmul.f32 0.03125, %v148_v3  ;;  %v189_v6 = vmul.f32 0.03125, %v151_v4 }
 0x127   :  { %885 = vrsqrt.f32 %v203_v2 }
 0x128   :  { %v204_v7 = vadd.f32 1e-05, %v188_v5  ;;  %v205_v8 = vadd.f32 1e-05, %v189_v6 }
 0x129   :  { %v154_v9 = vpop.xlane.xlu1 %153  ;;  %v157_v12 = vpop.xlane.xlu0 %156 }
 0x12a   :  { %887 = vrsqrt.f32 %v204_v7  ;;  %v190_v13 = vmul.f32 0.03125, %v154_v9  ;;  %v191_v14 = vmul.f32 0.03125, %v157_v12 }
 0x12b   :  { %889 = vrsqrt.f32 %v205_v8 }
 0x12c   :  { %v206_v15 = vadd.f32 1e-05, %v190_v13  ;;  %v207_v18 = vadd.f32 1e-05, %v191_v14 }
 0x12d   :  { %v160_v19 = vpop.xlane.xlu1 %159  ;;  %v163_v22 = vpop.xlane.xlu0 %162 }
 0x12e   :  { %891 = vrsqrt.f32 %v206_v15  ;;  %v192_v16 = vmul.f32 0.03125, %v160_v19  ;;  %v193_v26 = vmul.f32 0.03125, %v163_v22 }
 0x12f   :  { %v882_v27 = vpop.eup %881  ;;  %893 = vrsqrt.f32 %v207_v18 }
 0x130   :  { %v208_v30 = vadd.f32 1e-05, %v192_v16  ;;  %v209_v31 = vadd.f32 1e-05, %v193_v26  ;;  %v233_v33 = vmul.f32 %v882_v27, %v1092_v36 }
 0x131   :  { %v166_v34 = vpop.xlane.xlu1 %165  ;;  %v169_v20 = vpop.xlane.xlu0 %168 }
 0x132   :  { %895 = vrsqrt.f32 %v208_v30  ;;  %v194_v38 = vmul.f32 0.03125, %v166_v34  ;;  %v195_v39 = vmul.f32 0.03125, %v169_v20  ;;  %v253_v41 = vmul.f32 %v1192_v32, %v233_v33 }
 0x133   :  { %v884_v40 = vpop.eup %883  ;;  %897 = vrsqrt.f32 %v209_v31 }
 0x134   :  { %v886_v42 = vpop.eup %885  ;;  %v210_v43 = vadd.f32 1e-05, %v194_v38  ;;  %v211_v46 = vadd.f32 1e-05, %v195_v39  ;;  %v234_v48 = vmul.f32 %v884_v40, %v1100_v44  ;;  %v273_v53 = vadd.f32 %v1199_v24, %v253_v41 }
 0x135   :  { %v172_v36 = vpop.xlane.xlu1 %171  ;;  %v175_v49 = vpop.xlane.xlu0 %174  ;;  %v235_v50 = vmul.f32 %v886_v42, %v1094_v37 }
 0x136   :  { %899 = vrsqrt.f32 %v210_v43  ;;  %v196_v51 = vmul.f32 0.03125, %v172_v36  ;;  %v197_v52 = vmul.f32 0.03125, %v175_v49  ;;  %v254_v28 = vmul.f32 %v1192_v32, %v234_v48 }
 0x137   :  { %v888_v29 = vpop.eup %887  ;;  %901 = vrsqrt.f32 %v211_v46  ;;  %v255_v37 = vmul.f32 %v1192_v32, %v235_v50 }
 0x138   :  { %v890_v56 = vpop.eup %889  ;;  %v212_v57 = vadd.f32 1e-05, %v196_v51  ;;  %v213_v58 = vadd.f32 1e-05, %v197_v52  ;;  %v274_v59 = vadd.f32 %v1199_v24, %v254_v28  ;;  %v236_v44 = vmul.f32 %v888_v29, %v1102_v45 }
 0x139   :  { %v178_v60 = vpop.xlane.xlu1 %177  ;;  %v181_v61 = vpop.xlane.xlu0 %180  ;;  %v237_v62 = vmul.f32 %v890_v56, %v1111_v54  ;;  %v275_v54 = vadd.f32 %v1199_v24, %v255_v37 }
 0x13a   :  { %903 = vrsqrt.f32 %v212_v57  ;;  %v198_v63 = vmul.f32 0.03125, %v178_v60  ;;  %v199_v2 = vmul.f32 0.03125, %v181_v61  ;;  %v289_v3 = vpack.c.bf16 %v274_v59, %v273_v53 }
 0x13b   :  { %v892_v4 = vpop.eup %891  ;;  %905 = vrsqrt.f32 %v213_v58  ;;  %v256_v5 = vmul.f32 %v1192_v32, %v236_v44  ;;  %v257_v6 = vmul.f32 %v1192_v32, %v237_v62 }
 0x13c   :  { %v894_v7 = vpop.eup %893  ;;  %v214_v8 = vadd.f32 1e-05, %v198_v63  ;;  %v215_v9 = vadd.f32 1e-05, %v199_v2  ;;  %832 = vmatprep.mubr.msk.bf16.mxu0 %vm39_vm0, %v289_v3  ;;  %v238_v45 = vmul.f32 %v892_v4, %v1113_v55  ;;  %v878_v4 = vld [vmem:[%s1417_s3 + $0x10] sm:$0xff]  }
 0x13d   :  { %v184_v12 = vpop.xlane.xlu1 %183  ;;  %v276_v13 = vadd.f32 %v1199_v24, %v256_v5  ;;  %v239_v14 = vmul.f32 %v894_v7, %v1122_v0  ;;  %v277_v16 = vadd.f32 %v1199_v24, %v257_v6  ;;  %v1270_v5 = vld [vmem:[%s1415_s1 + $0x2] ss:$0 sm:$0xff] }
 0x13e   :  { %907 = vrsqrt.f32 %v214_v8  ;;  %v200_v15 = vmul.f32 0.03125, %v184_v12  ;;  %v258_v18 = vmul.f32 %v1192_v32, %v238_v45 }
 0x13f   :  { %v896_v19 = vpop.eup %895  ;;  %909 = vrsqrt.f32 %v215_v9  ;;  %v290_v22 = vpack.c.bf16 %v276_v13, %v275_v54  ;;  %v259_v31 = vmul.f32 %v1192_v32, %v239_v14 }
 0x140   :  { %v898_v26 = vpop.eup %897  ;;  %v216_v27 = vadd.f32 1e-05, %v200_v15  ;;  %v278_v55 = vadd.f32 %v1199_v24, %v258_v18  ;;  %v240_v30 = vmul.f32 %v896_v19, %v1125_v1 }
 0x141   :  { %833 = vmatmul.mubr.msk.bf16.vlgmr.msra.gmra.mxu0 %vm39_vm0, %v290_v22  ;;  %v241_v0 = vmul.f32 %v898_v26, %v1134_v10  ;;  %v279_v39 = vadd.f32 %v1199_v24, %v259_v31 }
 0x142   :  { %911 = vrsqrt.f32 %v216_v27  ;;  %v291_v33 = vpack.c.bf16 %v278_v55, %v277_v16  ;;  %v260_v34 = vmul.f32 %v1192_v32, %v240_v30 }
 0x143   :  { %v900_v20 = vpop.eup %899  ;;  %v261_v41 = vmul.f32 %v1192_v32, %v241_v0 }
 0x144   :  { %v902_v38 = vpop.eup %901  ;;  %836 = vmatprep.mubr.msk.bf16.mxu0 %vm39_vm0, %v291_v33  ;;  %v280_v40 = vadd.f32 %v1199_v24, %v260_v34  ;;  %v242_v1 = vmul.f32 %v900_v20, %v1137_v11 }
 0x145   :  { %v243_v42 = vmul.f32 %v902_v38, %v1146_v23  ;;  %v281_v36 = vadd.f32 %v1199_v24, %v261_v41 }
 0x146   :  { %v292_v43 = vpack.c.bf16 %v280_v40, %v279_v39  ;;  %v262_v10 = vmul.f32 %v1192_v32, %v242_v1 }
 0x147   :  { %v904_v46 = vpop.eup %903  ;;  %v263_v51 = vmul.f32 %v1192_v32, %v243_v42 }
 0x148   :  { %v906_v48 = vpop.eup %905  ;;  %v282_v49 = vadd.f32 %v1199_v24, %v262_v10  ;;  %v244_v50 = vmul.f32 %v904_v46, %v1149_v17 }
 0x149   :  { %837 = vmatmul.mubr.msk.bf16.gmra.mxu0 %vm39_vm0, %v292_v43  ;;  %v245_v11 = vmul.f32 %v906_v48, %v1158_v35  ;;  %v283_v53 = vadd.f32 %v1199_v24, %v263_v51 }
 0x14a   :  { %v293_v52 = vpack.c.bf16 %v282_v49, %v281_v36  ;;  %v264_v23 = vmul.f32 %v1192_v32, %v244_v50 }
 0x14b   :  { %v908_v28 = vpop.eup %907  ;;  %v265_v17 = vmul.f32 %v1192_v32, %v245_v11 }
 0x14c   :  { %v910_v29 = vpop.eup %909  ;;  %840 = vmatprep.mubr.msk.bf16.mxu0 %vm39_vm0, %v293_v52  ;;  %v284_v56 = vadd.f32 %v1199_v24, %v264_v23  ;;  %v246_v57 = vmul.f32 %v908_v28, %v1161_v21 }
 0x14d   :  { %v247_v58 = vmul.f32 %v910_v29, %v1170_v47  ;;  %v285_v60 = vadd.f32 %v1199_v24, %v265_v17 }
 0x14e   :  { %v294_v59 = vpack.c.bf16 %v284_v56, %v283_v53  ;;  %v266_v35 = vmul.f32 %v1192_v32, %v246_v57 }
 0x14f   :  { %v912_v44 = vpop.eup %911  ;;  %v267_v62 = vmul.f32 %v1192_v32, %v247_v58 }
 0x150   :  { %v286_v61 = vadd.f32 %v1199_v24, %v266_v35  ;;  %v248_v37 = vmul.f32 %v912_v44, %v1173_v25  ;;  %v877_v25 = vld [vmem:[%s1417_s3 + $0x18] sm:$0xff]  }
 0x151   :  { %841 = vmatmul.mubr.msk.bf16.gmra.mxu0 %vm39_vm0, %v294_v59  ;;  %v287_v47 = vadd.f32 %v1199_v24, %v267_v62  ;;  %848 = vmatprep.subr.bf16.mxu1 %v877_v25 }
 0x152   :  { %v295_v63 = vpack.c.bf16 %v286_v61, %v285_v60  ;;  %v268_v21 = vmul.f32 %v1192_v32, %v248_v37  ;;  %849 = vmatpush3.bf16.msra.mxu1 %v877_v25  ;;  %v879_v32 = vld [vmem:[%s1417_s3 + $0x8] sm:$0xff]  }
 0x153   :  { %850 = vmatprep.subr.bf16.mxu1 %v878_v4 }
 0x154   :  { %844 = vmatprep.mubr.msk.bf16.mxu0 %vm39_vm0, %v295_v63  ;;  %v288_v2 = vadd.f32 %v1199_v24, %v268_v21  ;;  %v880_v24 = vld [vmem:[%s1417_s3] sm:$0xff]  }
 0x156   :  { %v296_v3 = vpack.c.bf16 %v288_v2, %v287_v47  ;;  %851 = vmatpush3.bf16.msra.mxu1 %v878_v4 }
 0x157   :  { %852 = vmatprep.subr.bf16.mxu1 %v879_v32 }
 0x159   :  { %845 = vmatmul.mubr.msk.bf16.gmra.mxu0 %vm39_vm0, %v296_v3 }
 0x15a   :  { %853 = vmatpush3.bf16.msra.mxu1 %v879_v32 }
 0x15b   :  { %854 = vmatprep.subr.bf16.mxu1 %v880_v24 }
 0x15e   :  { %855 = vmatpush3.bf16.msra.mxu1 %v880_v24 }
 0x201   :  { %v834_v6 = vpop.f32.mrf.mxu0 }
 0x202   :  { %v1273_v7 = vadd.f32 %v834_v6, %v1270_v5 }
 0x203   :  { %v375_v8 = vpop.f32.mrf.mxu0 }
 0x204   :  { %v440_v9 = vmul.f32 %v1273_v7, %v1273_v7  ;;  %v1278_v45 = vadd.f32 %v1270_v5, %v375_v8 }
 0x205   :  { %v835_v12 = vpop.f32.mrf.mxu0 }
 0x206   :  { %v456_v54 = vmul.f32 %v440_v9, %v1273_v7  ;;  %v438_v13 = vmul.f32 %v1278_v45, %v1278_v45  ;;  %v1284_v14 = vadd.f32 %v835_v12, %v1270_v5 }
 0x207   :  { %v378_v15 = vpop.f32.mrf.mxu0 }
 0x208   :  { %v472_v18 = vmul.f32 0.044715, %v456_v54  ;;  %v454_v19 = vmul.f32 %v438_v13, %v1278_v45  ;;  %v441_v22 = vmul.f32 %v1284_v14, %v1284_v14  ;;  %v1290_v16 = vadd.f32 %v1270_v5, %v378_v15 }
 0x209   :  { %v838_v26 = vpop.f32.mrf.mxu0 }
 0x20a   :  { %v488_v27 = vadd.f32 %v472_v18, %v1273_v7  ;;  %v470_v55 = vmul.f32 0.044715, %v454_v19  ;;  %v457_v30 = vmul.f32 %v441_v22, %v1284_v14  ;;  %v439_v31 = vmul.f32 %v1290_v16, %v1290_v16 }
 0x20b   :  { %v1297_v0 = vadd.f32 %v838_v26, %v1270_v5  ;;  %v391_v33 = vpop.f32.mrf.mxu0 }
 0x20c   :  { %v504_v34 = vmul.f32 0.7978846, %v488_v27  ;;  %v486_v20 = vadd.f32 %v470_v55, %v1278_v45  ;;  %v473_v38 = vmul.f32 0.044715, %v457_v30  ;;  %v455_v39 = vmul.f32 %v439_v31, %v1290_v16 }
 0x20d   :  { %v444_v40 = vmul.f32 %v1297_v0, %v1297_v0  ;;  %v1304_v1 = vadd.f32 %v1270_v5, %v391_v33  ;;  %v839_v41 = vpop.f32.mrf.mxu0 }
 0x20e   :  { %913 = vtanh.f32 %v504_v34  ;;  %v502_v42 = vmul.f32 0.7978846, %v486_v20  ;;  %v489_v43 = vadd.f32 %v473_v38, %v1284_v14  ;;  %v471_v10 = vmul.f32 0.044715, %v455_v39 }
 0x20f   :  { %v460_v46 = vmul.f32 %v444_v40, %v1297_v0  ;;  %v442_v48 = vmul.f32 %v1304_v1, %v1304_v1  ;;  %v1311_v36 = vadd.f32 %v839_v41, %v1270_v5  ;;  %v394_v49 = vpop.f32.mrf.mxu0 }
 0x210   :  { %v505_v50 = vmul.f32 0.7978846, %v489_v43  ;;  %v487_v51 = vadd.f32 %v471_v10, %v1290_v16  ;;  %v1315_v11 = vadd.f32 %v1270_v5, %v394_v49  ;;  %915 = vtanh.f32 %v502_v42 }
 0x211   :  { %v476_v52 = vmul.f32 0.044715, %v460_v46  ;;  %v458_v23 = vmul.f32 %v442_v48, %v1304_v1  ;;  %v445_v28 = vmul.f32 %v1311_v36, %v1311_v36  ;;  %v842_v29 = vpop.f32.mrf.mxu0 }
 0x212   :  { %917 = vtanh.f32 %v505_v50  ;;  %v503_v53 = vmul.f32 0.7978846, %v487_v51  ;;  %v443_v56 = vmul.f32 %v1315_v11, %v1315_v11  ;;  %v1323_v57 = vadd.f32 %v842_v29, %v1270_v5 }
 0x213   :  { %v492_v17 = vadd.f32 %v476_v52, %v1297_v0  ;;  %v474_v58 = vmul.f32 0.044715, %v458_v23  ;;  %v461_v59 = vmul.f32 %v445_v28, %v1311_v36  ;;  %v407_v35 = vpop.f32.mrf.mxu0 }
 0x214   :  { %v459_v44 = vmul.f32 %v443_v56, %v1315_v11  ;;  %v448_v60 = vmul.f32 %v1323_v57, %v1323_v57  ;;  %v1331_v61 = vadd.f32 %v1270_v5, %v407_v35  ;;  %919 = vtanh.f32 %v503_v53 }
 0x215   :  { %v508_v37 = vmul.f32 0.7978846, %v492_v17  ;;  %v490_v62 = vadd.f32 %v474_v58, %v1304_v1  ;;  %v477_v63 = vmul.f32 0.044715, %v461_v59  ;;  %v843_v21 = vpop.f32.mrf.mxu0 }
 0x216   :  { %v475_v47 = vmul.f32 0.044715, %v459_v44  ;;  %v464_v2 = vmul.f32 %v448_v60, %v1323_v57  ;;  %v446_v3 = vmul.f32 %v1331_v61, %v1331_v61  ;;  %v1338_v25 = vadd.f32 %v843_v21, %v1270_v5 }
 0x217   :  { %921 = vtanh.f32 %v508_v37  ;;  %v506_v4 = vmul.f32 0.7978846, %v490_v62  ;;  %v493_v32 = vadd.f32 %v477_v63, %v1311_v36  ;;  %v410_v24 = vpop.f32.mrf.mxu0 }
 0x218   :  { %v491_v6 = vadd.f32 %v475_v47, %v1315_v11  ;;  %v480_v8 = vmul.f32 0.044715, %v464_v2  ;;  %v462_v9 = vmul.f32 %v446_v3, %v1331_v61  ;;  %v449_v12 = vmul.f32 %v1338_v25, %v1338_v25 }
 0x219   :  { %923 = vtanh.f32 %v506_v4  ;;  %v509_v54 = vmul.f32 0.7978846, %v493_v32  ;;  %v1346_v13 = vadd.f32 %v1270_v5, %v410_v24  ;;  %v846_v15 = vpop.f32.mrf.mxu0 }
 0x21a   :  { %v507_v18 = vmul.f32 0.7978846, %v491_v6  ;;  %v496_v19 = vadd.f32 %v480_v8, %v1323_v57  ;;  %v478_v22 = vmul.f32 0.044715, %v462_v9  ;;  %v465_v26 = vmul.f32 %v449_v12, %v1338_v25 }
 0x21b   :  { %v914_v27 = vpop.eup %913  ;;  %925 = vtanh.f32 %v509_v54  ;;  %v447_v55 = vmul.f32 %v1346_v13, %v1346_v13  ;;  %v1353_v30 = vadd.f32 %v846_v15, %v1270_v5  ;;  %v423_v31 = vpop.f32.mrf.mxu0 }
 0x21c   :  { %v536_v33 = vadd.f32 1.0, %v914_v27  ;;  %927 = vtanh.f32 %v507_v18  ;;  %v512_v34 = vmul.f32 0.7978846, %v496_v19  ;;  %v494_v20 = vadd.f32 %v478_v22, %v1331_v61 }
 0x21d   :  { %v481_v38 = vmul.f32 0.044715, %v465_v26  ;;  %v463_v39 = vmul.f32 %v447_v55, %v1346_v13  ;;  %v452_v40 = vmul.f32 %v1353_v30, %v1353_v30  ;;  %v1360_v41 = vadd.f32 %v1270_v5, %v423_v31  ;;  %v847_v42 = vpop.f32.mrf.mxu0  ;;  %v916_v43 = vpop.eup %915 }
 0x21e   :  { %929 = vtanh.f32 %v512_v34  ;;  %v510_v10 = vmul.f32 0.7978846, %v494_v20  ;;  %v1363_v46 = vadd.f32 %v847_v42, %v1270_v5  ;;  %v552_v28 = vmul.f32 0.5, %v536_v33 }
 0x21f   :  { %v918_v48 = vpop.eup %917  ;;  %v497_v49 = vadd.f32 %v481_v38, %v1338_v25  ;;  %v479_v50 = vmul.f32 0.044715, %v463_v39  ;;  %v468_v51 = vmul.f32 %v452_v40, %v1353_v30  ;;  %v450_v52 = vmul.f32 %v1360_v41, %v1360_v41  ;;  %v426_v23 = vpop.f32.mrf.mxu0 }
 0x220   :  { %v537_v29 = vadd.f32 1.0, %v918_v48  ;;  %931 = vtanh.f32 %v510_v10  ;;  %v453_v53 = vmul.f32 %v1363_v46, %v1363_v46  ;;  %v1375_v37 = vadd.f32 %v1270_v5, %v426_v23 }
 0x221   :  { %v920_v56 = vpop.eup %919  ;;  %v513_v17 = vmul.f32 0.7978846, %v497_v49  ;;  %v495_v58 = vadd.f32 %v479_v50, %v1346_v13  ;;  %v484_v59 = vmul.f32 0.044715, %v468_v51  ;;  %v466_v35 = vmul.f32 %v450_v52, %v1360_v41 }
 0x222   :  { %v553_v44 = vmul.f32 0.5, %v537_v29  ;;  %v469_v60 = vmul.f32 %v453_v53, %v1363_v46  ;;  %v534_v62 = vadd.f32 1.0, %v916_v43  ;;  %v451_v4 = vmul.f32 %v1375_v37, %v1375_v37 }
 0x223   :  { %933 = vtanh.f32 %v513_v17  ;;  %v511_v63 = vmul.f32 0.7978846, %v495_v58  ;;  %v500_v21 = vadd.f32 %v484_v59, %v1353_v30  ;;  %v482_v47 = vmul.f32 0.044715, %v466_v35 }
 0x224   :  { %v922_v2 = vpop.eup %921  ;;  %v485_v3 = vmul.f32 0.044715, %v469_v60  ;;  %v535_v32 = vadd.f32 1.0, %v920_v56  ;;  %v568_v24 = vmul.f32 %v552_v28, %v1273_v7  ;;  %v467_v12 = vmul.f32 %v451_v4, %v1375_v37 }
 0x225   :  { %935 = vtanh.f32 %v511_v63  ;;  %v516_v6 = vmul.f32 0.7978846, %v500_v21  ;;  %v498_v5 = vadd.f32 %v482_v47, %v1360_v41  ;;  %v550_v54 = vmul.f32 0.5, %v534_v62 }
 0x226   :  { %v924_v8 = vpop.eup %923  ;;  %v501_v9 = vadd.f32 %v485_v3, %v1363_v46  ;;  %v551_v15 = vmul.f32 0.5, %v535_v32  ;;  %v569_v18 = vmul.f32 %v553_v44, %v1284_v14  ;;  %v483_v55 = vmul.f32 0.044715, %v467_v12 }
 0x227   :  { %v538_v19 = vadd.f32 1.0, %v924_v8  ;;  %937 = vtanh.f32 %v516_v6  ;;  %v514_v22 = vmul.f32 0.7978846, %v498_v5  ;;  %v566_v7 = vmul.f32 %v550_v54, %v1278_v45 }
 0x228   :  { %v926_v26 = vpop.eup %925  ;;  %v517_v27 = vmul.f32 0.7978846, %v501_v9  ;;  %v567_v31 = vmul.f32 %v551_v15, %v1290_v16  ;;  %v540_v34 = vadd.f32 1.0, %v922_v2  ;;  %v499_v40 = vadd.f32 %v483_v55, %v1375_v37 }
 0x229   :  { %v928_v33 = vpop.eup %927  ;;  %v554_v20 = vmul.f32 0.5, %v538_v19  ;;  %v541_v38 = vadd.f32 1.0, %v926_v26  ;;  %939 = vtanh.f32 %v514_v22  ;;  %v583_v10 = vpack.c.bf16 %v569_v18, %v568_v24  ;;  %v793_v22 = vld [vmem:[%s1415_s1 + $0x3] ss:$0 sm:$0xff]  ;;  %s967_s1 = smov [#allocation2]  }
 0x22a   :  { %v539_v39 = vadd.f32 1.0, %v928_v33  ;;  %941 = vtanh.f32 %v517_v27  ;;  %v582_v14 = vpack.c.bf16 %v567_v31, %v566_v7  ;;  %v515_v49 = vmul.f32 0.7978846, %v499_v40  ;;  %s769_s12 = sshll.u32 %s967_s1, 4  ;;  %s770_s12 = int_to_ptr.vmem [resolvable:$true] %s769_s12 }
 0x22b   :  { %v930_v42 = vpop.eup %929  ;;  %v557_v43 = vmul.f32 0.5, %v541_v38  ;;  %v556_v50 = vmul.f32 0.5, %v540_v34  ;;  %v570_v16 = vmul.f32 %v554_v20, %v1304_v1  ;;  %s945_s13 = scalar_lea.vmem %s770_s12, 2048  ;;  %p950_p1 = scmp.lt.s32.totalorder %s770_s12, %s770_s12 }
 0x22c   :  { %v555_v48 = vmul.f32 0.5, %v539_v39  ;;  %856 = vmatprep.mubr.msk.bf16.mxu1 %vm626_vm1, %v582_v14  ;;  %943 = vtanh.f32 %v515_v49  ;;  %v544_v56 = vadd.f32 1.0, %v930_v42  ;;  %p946_p0 = scmp.ne.s32.totalorder %s770_s12, %s945_s13  ;;  %p951_p2 = scmp.lt.s32.totalorder %s945_s13, %s945_s13 }
 0x22d   :  { %v932_v45 = vpop.eup %931  ;;  %857 = vmatmul.mubr.msk.bf16.vlgmr.msra.gmra.mxu1 %vm626_vm1, %v583_v10  ;;  %v573_v52 = vmul.f32 %v557_v43, %v1311_v36  ;;  %v572_v53 = vmul.f32 %v556_v50, %v1297_v0 }
 0x22e   :  { %v571_v51 = vmul.f32 %v555_v48, %v1315_v11  ;;  %v542_v23 = vadd.f32 1.0, %v932_v45  ;;  %v560_v62 = vmul.f32 0.5, %v544_v56  ;;  %p952_p3 = por %p951_p2, %p950_p1 }
 0x22f   :  { %v585_v60 = vpack.c.bf16 %v573_v52, %v572_v53 }
 0x230   :  { %v934_v28 = vpop.eup %933  ;;  %v584_v29 = vpack.c.bf16 %v571_v51, %v570_v16  ;;  %v558_v59 = vmul.f32 0.5, %v542_v23  ;;  %v576_v4 = vmul.f32 %v560_v62, %v1323_v57  ;;  %p953_p4 = pnand %p952_p3, %p946_p0 }
 0x231   :  { %v545_v17 = vadd.f32 1.0, %v934_v28 }
 0x232   :  { %v936_v58 = vpop.eup %935  ;;  %860 = vmatprep.mubr.msk.bf16.mxu1 %vm626_vm1, %v584_v29  ;;  %v574_v21 = vmul.f32 %v558_v59, %v1331_v61 }
 0x233   :  { %v561_v35 = vmul.f32 0.5, %v545_v17  ;;  %v543_v44 = vadd.f32 1.0, %v936_v58 }
 0x234   :  { %v938_v1 = vpop.eup %937 }
 0x235   :  { %v559_v11 = vmul.f32 0.5, %v543_v44  ;;  %861 = vmatmul.mubr.msk.bf16.gmra.mxu1 %vm626_vm1, %v585_v60  ;;  %v577_v0 = vmul.f32 %v561_v35, %v1338_v25  ;;  %v548_v32 = vadd.f32 1.0, %v938_v1 }
 0x236   :  { %v940_v36 = vpop.eup %939 }
 0x237   :  { %v942_v63 = vpop.eup %941  ;;  %v575_v47 = vmul.f32 %v559_v11, %v1346_v13  ;;  %v546_v2 = vadd.f32 1.0, %v940_v36  ;;  %v587_v8 = vpack.c.bf16 %v577_v0, %v576_v4  ;;  %v564_v54 = vmul.f32 0.5, %v548_v32 }
 0x238   :  { %v549_v3 = vadd.f32 1.0, %v942_v63 }
 0x239   :  { %v586_v24 = vpack.c.bf16 %v575_v47, %v574_v21  ;;  %v944_v6 = vpop.eup %943  ;;  %v562_v9 = vmul.f32 0.5, %v546_v2  ;;  %v580_v57 = vmul.f32 %v564_v54, %v1353_v30 }
 0x23a   :  { %v565_v5 = vmul.f32 0.5, %v549_v3  ;;  %v547_v12 = vadd.f32 1.0, %v944_v6 }
 0x23b   :  { %864 = vmatprep.mubr.msk.bf16.mxu1 %vm626_vm1, %v586_v24  ;;  %v578_v13 = vmul.f32 %v562_v9, %v1360_v41 }
 0x23c   :  { %v563_v61 = vmul.f32 0.5, %v547_v12  ;;  %v581_v25 = vmul.f32 %v565_v5, %v1363_v46 }
 0x23d   :  { %865 = vmatmul.mubr.msk.bf16.gmra.mxu1 %vm626_vm1, %v587_v8 }
 0x23e   :  { %v579_v15 = vmul.f32 %v563_v61, %v1375_v37  ;;  %v589_v19 = vpack.c.bf16 %v581_v25, %v580_v57 }
 0x240   :  { %v588_v18 = vpack.c.bf16 %v579_v15, %v578_v13 }
 0x242   :  { %868 = vmatprep.mubr.msk.bf16.mxu1 %vm626_vm1, %v588_v18 }
 0x245   :  { %869 = vmatmul.mubr.msk.bf16.gmra.mxu1 %vm626_vm1, %v589_v19 }
 0x2ed   :  { %v858_v26 = vpop.f32.mrf.mxu1 }
 0x2ee   :  { %v694_v27 = vadd.f32 %v858_v26, %v793_v22 }
 0x2ef   :  { %v685_v55 = vpop.f32.mrf.mxu1 }
 0x2f0   :  { %750 = vst [vmem:[#allocation2 + $0x10] sm:$0xff] %v694_v27  ;;  %v686_v46 = vadd.f32 %v793_v22, %v685_v55 }
 0x2f1   :  { %v859_v41 = vpop.f32.mrf.mxu1 }
 0x2f2   :  { %748 = vst [vmem:[#allocation2] sm:$0xff] %v686_v46  ;;  %v697_v37 = vadd.f32 %v859_v41, %v793_v22 }
 0x2f3   :  { %v688_v7 = vpop.f32.mrf.mxu1 }
 0x2f4   :  { %751 = vst [vmem:[#allocation2 + $0x18] sm:$0xff] %v697_v37  ;;  %v689_v30 = vadd.f32 %v793_v22, %v688_v7 }
 0x2f5   :  { %v862_v31 = vpop.f32.mrf.mxu1 }
 0x2f6   :  { %749 = vst [vmem:[#allocation2 + $0x8] sm:$0xff] %v689_v30  ;;  %v710_v33 = vadd.f32 %v862_v31, %v793_v22 }
 0x2f7   :  { %v701_v34 = vpop.f32.mrf.mxu1 }
 0x2f8   :  { %754 = vst [vmem:[#allocation2 + $0x30] sm:$0xff] %v710_v33  ;;  %v702_v20 = vadd.f32 %v793_v22, %v701_v34 }
 0x2f9   :  { %v863_v38 = vpop.f32.mrf.mxu1 }
 0x2fa   :  { %752 = vst [vmem:[#allocation2 + $0x20] sm:$0xff] %v702_v20  ;;  %v713_v39 = vadd.f32 %v863_v38, %v793_v22 }
 0x2fb   :  { %v704_v40 = vpop.f32.mrf.mxu1 }
 0x2fc   :  { %755 = vst [vmem:[#allocation2 + $0x38] sm:$0xff] %v713_v39  ;;  %v705_v14 = vadd.f32 %v793_v22, %v704_v40 }
 0x2fd   :  { %v866_v42 = vpop.f32.mrf.mxu1 }
 0x2fe   :  { %753 = vst [vmem:[#allocation2 + $0x28] sm:$0xff] %v705_v14  ;;  %v726_v43 = vadd.f32 %v866_v42, %v793_v22 }
 0x2ff   :  { %v717_v10 = vpop.f32.mrf.mxu1 }
 0x300   :  { %758 = vst [vmem:[#allocation2 + $0x50] sm:$0xff] %v726_v43  ;;  %v718_v48 = vadd.f32 %v793_v22, %v717_v10 }
 0x301   :  { %v867_v49 = vpop.f32.mrf.mxu1 }
 0x302   :  { %756 = vst [vmem:[#allocation2 + $0x40] sm:$0xff] %v718_v48  ;;  %v729_v45 = vadd.f32 %v867_v49, %v793_v22 }
 0x303   :  { %v720_v50 = vpop.f32.mrf.mxu1 }
 0x304   :  { %759 = vst [vmem:[#allocation2 + $0x58] sm:$0xff] %v729_v45  ;;  %v721_v16 = vadd.f32 %v793_v22, %v720_v50 }
 0x305   :  { %v870_v51 = vpop.f32.mrf.mxu1 }
 0x306   :  { %757 = vst [vmem:[#allocation2 + $0x48] sm:$0xff] %v721_v16  ;;  %v742_v52 = vadd.f32 %v870_v51, %v793_v22 }
 0x307   :  { %v733_v23 = vpop.f32.mrf.mxu1 }
 0x308   :  { %762 = vst [vmem:[#allocation2 + $0x70] sm:$0xff] %v742_v52  ;;  %v734_v28 = vadd.f32 %v793_v22, %v733_v23 }
 0x309   :  { %v871_v29 = vpop.f32.mrf.mxu1 }
 0x30a   :  { %760 = vst [vmem:[#allocation2 + $0x60] sm:$0xff] %v734_v28  ;;  %v745_v53 = vadd.f32 %v871_v29, %v793_v22 }
 0x30b   :  { %v736_v56 = vpop.f32.mrf.mxu1 }
 0x30c   :  { %763 = vst [vmem:[#allocation2 + $0x78] sm:$0xff] %v745_v53  ;;  %v737_v17 = vadd.f32 %v793_v22, %v736_v56 }
 0x30e   :  { %761 = vst [vmem:[#allocation2 + $0x68] sm:$0xff] %v737_v17 }
 0x30f   :  { %956 = shalt.err (!%p953_p4)
}
 0x310   :  { %s968_s14 = smov 128   ;;  %s969_s15 = smov 8  }
 0x311   :  { %775 = dma.vmem_to_hbm [thread:$0]  %s770_s12, 2048, %s1418_s4, [#allocation3], %s968_s14, %s968_s14, %s969_s15  }
 0x312   :  { %965 = dma.done.wait [#allocation3], 2048  }
 0x313   :  { %966 = vsyncadd [#allocation3], 4294965248 }
 0x314   :  { %779 = vsyncpa [#allocation3], 1 }

</bundles_post_ra>
